<compile_context>
chip_gen: v6e
topology: v6e:2x2x1
jax: 0.10.0
libtpu: 0.0.40
codegen_flags: <defaults>
</compile_context>

<pallas_src>
import functools

import jax
import jax.numpy as jnp
from jax.experimental import pallas as pl
from jax.experimental.pallas import tpu as pltpu

SUBLANE = 8     # f32 sublane granularity
LANE = 128      # lane width


def _round_up(x, m):
    return ((x + m - 1) // m) * m


def _cdiv(a, b):
    return (a + b - 1) // b


def dqn_kernel(x_ref, w1_ref, b1_ref, w2_ref, b2_ref, o_ref):
    out_dim = o_ref.shape[-1]
    # In-kernel cast of x to the MXU operand dtype (no extra HBM pass in the wrapper).
    x = x_ref[...].astype(w1_ref.dtype)
    # fc1: Linear(input_dim, 64) + ReLU  (MXU matmul, f32 accumulate).
    h = jnp.dot(x, w1_ref[...], preferred_element_type=jnp.float32)
    # Bias add + ReLU stay in f32 on the VPU (v5e has no bf16 VPU).
    h = jnp.maximum(h + b1_ref[...], 0.0)
    # fc2 against the lane-padded (64, 128) weight -> single clean MXU op; note this
    # re-rounds h to bf16 when use_bf16=True (fine for DQN Q-values).
    out = jnp.dot(h.astype(w2_ref.dtype), w2_ref[...],
                  preferred_element_type=jnp.float32)
    q = out + b2_ref[...]
    # Store only the real Q-value columns: masked store, but ~64x less HBM writeback
    # than a 128-lane-padded f32 output.
    o_ref[...] = q[:, :out_dim].astype(o_ref.dtype)


def prepare_dqn_params(w1, b1, w2, b2, *, use_bf16=False):
    """One-time parameter preparation (call when params change, NOT per forward).

    Zero-pads w2/b2 to 128 lanes for a lane-aligned MXU matmul and optionally casts
    MXU weight operands to bf16. Biases remain f32 (VPU math stays f32; v5e has no
    bf16 VPU).
    """
    hidden, out_dim = w2.shape
    out_pad = _round_up(max(out_dim, LANE), LANE)
    w2p = jnp.zeros((hidden, out_pad), w2.dtype).at[:, :out_dim].set(w2)
    b2p = jnp.zeros((1, out_pad), jnp.float32).at[:, :out_dim].set(b2)
    if use_bf16:
        w1 = w1.astype(jnp.bfloat16)
        w2p = w2p.astype(jnp.bfloat16)
    return (w1, b1.astype(jnp.float32), w2p, b2p, out_dim)


@functools.partial(jax.jit, static_argnames=("out_dim", "block_b"))
def _dqn_forward_impl(x, w1, b1, w2p, b2p, *, out_dim, block_b):
    B, in_dim = x.shape
    hidden = w1.shape[1]
    out_pad = w2p.shape[1]

    # --- Batch tiling: multiple of 8 sublanes; pad ragged last tile with zeros. ---
    tb = _round_up(min(block_b, _round_up(B, SUBLANE)), SUBLANE)
    Bp = _round_up(B, tb)
    # Keep >= 2 parallel tiles whenever there is enough work, so both of v7x's
    # TensorCores are used (no-op on single-TC v5e/v6e).
    if Bp // tb < 2 and Bp >= 2 * SUBLANE:
        tb = _round_up(_cdiv(Bp, 2), SUBLANE)
        Bp = _round_up(B, tb)
    if Bp != B:
        x = jnp.pad(x, ((0, Bp - B), (0, 0)))

    grid = (Bp // tb,)
    out = pl.pallas_call(
        dqn_kernel,
        out_shape=jax.ShapeDtypeStruct((Bp, out_dim), jnp.float32),
        grid=grid,
        in_specs=[
            # x: one batch tile per grid step (native dtype; cast happens in-kernel).
            pl.BlockSpec((tb, in_dim), lambda i: (i, 0)),
            # Weights / biases: same block every step -> stay resident in VMEM.
            pl.BlockSpec((in_dim, hidden), lambda i: (0, 0)),
            pl.BlockSpec((1, hidden), lambda i: (0, 0)),
            pl.BlockSpec((hidden, out_pad), lambda i: (0, 0)),
            pl.BlockSpec((1, out_pad), lambda i: (0, 0)),
        ],
        # Narrow output block spans the full (tiny) last dim -> contiguous writeback.
        out_specs=pl.BlockSpec((tb, out_dim), lambda i: (i, 0)),
        compiler_params=pltpu.CompilerParams(
            # Batch tiles are independent -> shard across TensorCores (v7x megacore).
            dimension_semantics=("parallel",)),
    )(x, w1, b1, w2p, b2p)

    # Slice off batch padding only (no lane padding in the output anymore).
    return out[:B, :]


def dqn_forward(x, prepared_params, *, block_b=2048):
    """y = relu(x @ w1 + b1) @ w2 + b2, batch-tiled.

    prepared_params: output of prepare_dqn_params (padding/casting already hoisted).
    block_b: max batch tile size; large tiles amortize per-step pipeline overhead and
             still use only ~a few hundred KiB of VMEM per step.
    """
    w1, b1, w2p, b2p, out_dim = prepared_params
    return _dqn_forward_impl(x, w1, b1, w2p, b2p, out_dim=out_dim, block_b=block_b)


# TODO(synk): optional action-selection variant that fuses argmax over the 2 Q-values
# and emits only (B, 1) int32, cutting writeback to 4 B/row.


def init_dqn_params(key, input_dim, hidden=64, out_dim=2):
    """Deterministic init mimicking torch.nn.Linear default (uniform +/- 1/sqrt(fan_in))."""
    k1, k2, k3, k4 = jax.random.split(key, 4)
    bound1 = 1.0 / jnp.sqrt(jnp.float32(input_dim))
    bound2 = 1.0 / jnp.sqrt(jnp.float32(hidden))
    w1 = jax.random.uniform(k1, (input_dim, hidden), jnp.float32, -bound1, bound1)
    b1 = jax.random.uniform(k2, (1, hidden), jnp.float32, -bound1, bound1)
    w2 = jax.random.uniform(k3, (hidden, out_dim), jnp.float32, -bound2, bound2)
    b2 = jax.random.uniform(k4, (1, out_dim), jnp.float32, -bound2, bound2)
    return w1, b1, w2, b2


def _ref_forward(x, w1, b1, w2, b2):
    return jnp.maximum(x @ w1 + b1, 0.0) @ w2 + b2


if __name__ == "__main__":
    key = jax.random.PRNGKey(0)
    input_dim = 16

    kx, kp, kx2, kx3 = jax.random.split(key, 4)
    w1, b1, w2, b2 = init_dqn_params(kp, input_dim)
    # Hoisted weight prep: done once, reused across forwards.
    prepared = prepare_dqn_params(w1, b1, w2, b2, use_bf16=False)

    # Small-shape check (B=2): overhead-bound case, still must be correct.
    x = jax.random.normal(kx, (2, input_dim), jnp.float32)
    out = jax.block_until_ready(dqn_forward(x, prepared))
    ref = _ref_forward(x, w1, b1, w2, b2)
    assert out.shape == (2, 2)
    assert jnp.allclose(out, ref, atol=1e-5, rtol=1e-5)

    # Ragged-batch check (exercises batch padding / tiling / >=2-tile split path).
    x2 = jax.random.normal(kx2, (37, input_dim), jnp.float32)
    out2 = jax.block_until_ready(dqn_forward(x2, prepared))
    ref2 = _ref_forward(x2, w1, b1, w2, b2)
    assert out2.shape == (37, 2)
    assert jnp.allclose(out2, ref2, atol=1e-5, rtol=1e-5)

    # Larger replay-buffer-style batch (multi-tile grid, both TCs on v7x).
    x3 = jax.random.normal(kx3, (1024, input_dim), jnp.float32)
    out3 = jax.block_until_ready(dqn_forward(x3, prepared, block_b=2048))
    ref3 = _ref_forward(x3, w1, b1, w2, b2)
    assert out3.shape == (1024, 2)
    assert jnp.allclose(out3, ref3, atol=1e-4, rtol=1e-4)

    print("KERNEL_OK")
</pallas_src>

<mosaic_0001>
module attributes {stable_mosaic.version = 11 : i64} {
  func.func @dqn_kernel(%arg0: i32, %arg1: memref<8x16xf32, #tpu.memory_space<vmem>>, %arg2: memref<16x64xf32, #tpu.memory_space<vmem>>, %arg3: memref<1x64xf32, #tpu.memory_space<vmem>>, %arg4: memref<64x128xf32, #tpu.memory_space<vmem>>, %arg5: memref<1x128xf32, #tpu.memory_space<vmem>>, %arg6: memref<8x2xf32, #tpu.memory_space<vmem>>) attributes {dimension_semantics = [#tpu.dimension_semantics<parallel>], iteration_bounds = array<i64: 1>, scalar_prefetch = 0 : i64, scratch_operands = 0 : i64, tpu.core_type = #tpu.core_type<tc>, window_params = [{transform_indices = @transform_0, window_bounds = array<i64: 8, 16>}, {pipeline_mode = #tpu.pipeline_mode<synchronous>, transform_indices = @transform_1, window_bounds = array<i64: 16, 64>}, {pipeline_mode = #tpu.pipeline_mode<synchronous>, transform_indices = @transform_2, window_bounds = array<i64: 1, 64>}, {pipeline_mode = #tpu.pipeline_mode<synchronous>, transform_indices = @transform_3, window_bounds = array<i64: 64, 128>}, {pipeline_mode = #tpu.pipeline_mode<synchronous>, transform_indices = @transform_4, window_bounds = array<i64: 1, 128>}, {transform_indices = @transform_5, window_bounds = array<i64: 8, 2>}]} {
    %c0 = arith.constant 0 : index
    %c0_0 = arith.constant 0 : index
    %0 = vector.load %arg1[%c0, %c0_0] : memref<8x16xf32, #tpu.memory_space<vmem>>, vector<8x16xf32>
    %c0_1 = arith.constant 0 : index
    %c0_2 = arith.constant 0 : index
    %1 = vector.load %arg2[%c0_1, %c0_2] : memref<16x64xf32, #tpu.memory_space<vmem>>, vector<16x64xf32>
    %cst = arith.constant dense<0.000000e+00> : vector<8x64xf32>
    %2 = tpu.matmul %0, %1, %cst {dimension_numbers = #tpu.dot_dimension_numbers<[1], [0], [0], [1], [0, 0, 1, 1], [], []>} : vector<8x16xf32>, vector<16x64xf32>, vector<8x64xf32> -> vector<8x64xf32>
    %c0_3 = arith.constant 0 : index
    %c0_4 = arith.constant 0 : index
    %3 = vector.load %arg3[%c0_3, %c0_4] : memref<1x64xf32, #tpu.memory_space<vmem>>, vector<1x64xf32>
    %4 = vector.broadcast %3 : vector<1x64xf32> to vector<8x64xf32>
    %5 = arith.addf %2, %4 : vector<8x64xf32>
    %cst_5 = arith.constant 0.000000e+00 : f32
    %6 = vector.broadcast %cst_5 : f32 to vector<8x64xf32>
    %7 = arith.maximumf %5, %6 : vector<8x64xf32>
    %c0_6 = arith.constant 0 : index
    %c0_7 = arith.constant 0 : index
    %8 = vector.load %arg4[%c0_6, %c0_7] : memref<64x128xf32, #tpu.memory_space<vmem>>, vector<64x128xf32>
    %cst_8 = arith.constant dense<0.000000e+00> : vector<8x128xf32>
    %9 = tpu.matmul %7, %8, %cst_8 {dimension_numbers = #tpu.dot_dimension_numbers<[1], [0], [0], [1], [0, 0, 1, 1], [], []>} : vector<8x64xf32>, vector<64x128xf32>, vector<8x128xf32> -> vector<8x128xf32>
    %c0_9 = arith.constant 0 : index
    %c0_10 = arith.constant 0 : index
    %10 = vector.load %arg5[%c0_9, %c0_10] : memref<1x128xf32, #tpu.memory_space<vmem>>, vector<1x128xf32>
    %11 = vector.broadcast %10 : vector<1x128xf32> to vector<8x128xf32>
    %12 = arith.addf %9, %11 : vector<8x128xf32>
    %13 = vector.extract_strided_slice %12 {offsets = [0, 0], sizes = [8, 2], strides = [1, 1]} : vector<8x128xf32> to vector<8x2xf32>
    %c0_11 = arith.constant 0 : index
    %c0_12 = arith.constant 0 : index
    %14 = vector.load %arg6[%c0_11, %c0_12] : memref<8x2xf32, #tpu.memory_space<vmem>>, vector<8x2xf32>
    tpu.vector_store %arg6[%c0_11, %c0_12], %13 {strides = array<i32>} : memref<8x2xf32, #tpu.memory_space<vmem>>, vector<8x2xf32>,
    return
  }
  func.func @transform_0(%arg0: i32) -> (i32, i32) {
    %c0_i32 = arith.constant 0 : i32
    %c0_i32_0 = arith.constant 0 : i32
    return %arg0, %c0_i32 : i32, i32
  }
  func.func @transform_1(%arg0: i32) -> (i32, i32) {
    %c0_i32 = arith.constant 0 : i32
    %c0_i32_0 = arith.constant 0 : i32
    %c0_i32_1 = arith.constant 0 : i32
    return %c0_i32, %c0_i32_0 : i32, i32
  }
  func.func @transform_2(%arg0: i32) -> (i32, i32) {
    %c0_i32 = arith.constant 0 : i32
    %c0_i32_0 = arith.constant 0 : i32
    %c0_i32_1 = arith.constant 0 : i32
    return %c0_i32, %c0_i32_0 : i32, i32
  }
  func.func @transform_3(%arg0: i32) -> (i32, i32) {
    %c0_i32 = arith.constant 0 : i32
    %c0_i32_0 = arith.constant 0 : i32
    %c0_i32_1 = arith.constant 0 : i32
    return %c0_i32, %c0_i32_0 : i32, i32
  }
  func.func @transform_4(%arg0: i32) -> (i32, i32) {
    %c0_i32 = arith.constant 0 : i32
    %c0_i32_0 = arith.constant 0 : i32
    %c0_i32_1 = arith.constant 0 : i32
    return %c0_i32, %c0_i32_0 : i32, i32
  }
  func.func @transform_5(%arg0: i32) -> (i32, i32) {
    %c0_i32 = arith.constant 0 : i32
    %c0_i32_0 = arith.constant 0 : i32
    return %arg0, %c0_i32 : i32, i32
  }
}

</mosaic_0001>

<bundles_post_ra>
// kernel: _dqn_forward_impl.1
= control target key start
LH: loop header
LB: loop body
LE: loop exit
PB: predicated region body
PF: predicated region fallthrough
CT: control target
= control target key end

     0   :  { %10 = vsyncpa [#allocation3], 0  ;;  %s376_s0 = inlined_call_operand.vmem [shape: f32[8,16], index: 0, kind: input, shape index: {}]   ;;  %s377_s1 = inlined_call_operand.hbm [shape: f32[16,64], index: 1, kind: input, shape index: {}]   ;;  %s378_s2 = inlined_call_operand.vmem [shape: f32[1,64], index: 2, kind: input, shape index: {}]   ;;  %s379_s3 = inlined_call_operand.hbm [shape: f32[64,128], index: 3, kind: input, shape index: {}]   ;;  %s380_s4 = inlined_call_operand.vmem [shape: f32[1,128], index: 4, kind: input, shape index: {}]   ;;  %s381_s5 = inlined_call_operand.vmem [shape: f32[8,2], index: 5, kind: output, shape index: {}]  }
   0x1   :  { %11 = vsyncpa [#allocation5], 0  ;;  %s322_s18 = smov [#allocation2]  }
   0x2   :  { %s19_s19 = sshll.u32 %s322_s18, 4  ;;  %s20_s19 = int_to_ptr.vmem [resolvable:$true] %s19_s19 }
   0x3   :  { %s286_s20 = scalar_lea.vmem %s20_s19, 256  ;;  %p291_p1 = scmp.lt.s32.totalorder %s20_s19, %s20_s19 }
   0x4   :  { %p287_p0 = scmp.ne.s32.totalorder %s20_s19, %s286_s20  ;;  %p292_p2 = scmp.lt.s32.totalorder %s286_s20, %s286_s20 }
   0x6   :  { %p293_p3 = por %p292_p2, %p291_p1 }
   0x8   :  { %p294_p4 = pnand %p293_p3, %p287_p0 }
   0xa   :  { %297 = shalt.err (!%p294_p4)
}
   0xb   :  { %s323_s21 = smov 128   ;;  %s324_s22 = smov 8  }
   0xc   :  { %25 = dma.hbm_to_vmem [thread:$0]  %s377_s1, 256, %s20_s19, [#allocation3], %s323_s21, %s323_s21, %s324_s22  }
   0xd   :  { %s325_s25 = smov [#allocation4]  }
   0xe   :  { %s33_s26 = sshll.u32 %s325_s25, 4  ;;  %s34_s26 = int_to_ptr.vmem [resolvable:$true] %s33_s26 }
   0xf   :  { %s306_s27 = scalar_lea.vmem %s34_s26, 1024  ;;  %p311_p6 = scmp.lt.s32.totalorder %s34_s26, %s34_s26 }
  0x10   :  { %p307_p5 = scmp.ne.s32.totalorder %s34_s26, %s306_s27  ;;  %p312_p7 = scmp.lt.s32.totalorder %s306_s27, %s306_s27 }
  0x12   :  { %p313_p8 = por %p312_p7, %p311_p6 }
  0x14   :  { %p314_p9 = pnand %p313_p8, %p307_p5 }
  0x16   :  { %317 = shalt.err (!%p314_p9)
}
  0x17   :  { %39 = dma.hbm_to_vmem [thread:$0]  %s379_s3, 1024, %s34_s26, [#allocation5], %s323_s21, %s323_s21, %s324_s22  }
  0x18   :  { %318 = dma.done.wait [#allocation3], 256  }
  0x19   :  { %319 = vsyncadd [#allocation3], 4294967040 }
  0x1a   :  { %320 = dma.done.wait [#allocation5], 1024  }
  0x1b   :  { %321 = vsyncadd [#allocation5], 4294966272  ;;  %v326_v0 = vmov 0.0   ;;  %vm327_vm0 = vmmov 0   ;;  %v50_v1 = vld [vmem:[#allocation2 + $0x8] sm:$0xff]  ;;  %v49_v2 = vld [vmem:[#allocation2] sm:$0xff] }
  0x1c   :  { %246 = vmatprep.subr.mxu0 %v326_v0  ;;  %250 = vmatprep.mubr.msk.f32.mxu0 %vm327_vm0, %v326_v0  ;;  %v48_v3 = vld [vmem:[%s376_s0] sm:$0xff]  ;;  %vm58_vm1 = vcmask 130048   ;;  %v140_v4 = vld [vmem:[#allocation4 + $0x38] sm:$0xff]  ;;  %v138_v6 = vld [vmem:[#allocation4 + $0x28] sm:$0xff]  ;;  %vm148_vm2 = vcmask 523264   ;;  %vm222_vm3 = vcmask 15360  }
  0x1d   :  { %253 = vmatprep.subr.mxu1 %v326_v0  ;;  %269 = vmatprep.mubr.msk.f32.mxu1 %vm327_vm0, %v326_v0  ;;  %v139_v5 = vld [vmem:[#allocation4 + $0x30] sm:$0xff]  ;;  %v137_v7 = vld [vmem:[#allocation4 + $0x20] sm:$0xff]  ;;  %v136_v8 = vld [vmem:[#allocation4 + $0x18] sm:$0xff] }
  0x1e   :  { %247 = vmatpush3.msra.mxu0 %v50_v1  ;;  %254 = vmatpush3.msra.mxu1 %v140_v4  ;;  %v135_v9 = vld [vmem:[#allocation4 + $0x10] sm:$0xff]  ;;  %v134_v10 = vld [vmem:[#allocation4 + $0x8] sm:$0xff]  ;;  %v133_v11 = vld [vmem:[#allocation4] sm:$0xff] }
  0x1f   :  { %248 = vmatprep.subr.mxu0 %v326_v0  ;;  %255 = vmatprep.subr.mxu1 %v326_v0  ;;  %v230_v12 = vld [vmem:[%s378_s2] ss:$0 sm:$0xff] }
  0x20   :  { %249 = vmatpush3.msra.mxu0 %v49_v2  ;;  %256 = vmatpush3.msra.mxu1 %v139_v5  ;;  %v232_v17 = vld [vmem:[%s380_s4] ss:$0 sm:$0xff] }
  0x21   :  { %251 = vmatmul.mubr.msk.f32.vlgmr.msra.gmra.mxu0 %vm58_vm1, %v48_v3  ;;  %257 = vmatprep.subr.mxu1 %v326_v0 }
  0x22   :  { %258 = vmatpush3.msra.mxu1 %v138_v6 }
  0x23   :  { %259 = vmatprep.subr.mxu1 %v326_v0 }
  0x24   :  { %260 = vmatpush3.msra.mxu1 %v137_v7 }
  0x25   :  { %261 = vmatprep.subr.mxu1 %v326_v0 }
  0x26   :  { %262 = vmatpush3.msra.mxu1 %v136_v8 }
  0x27   :  { %263 = vmatprep.subr.mxu1 %v326_v0 }
  0x28   :  { %264 = vmatpush3.msra.mxu1 %v135_v9 }
  0x29   :  { %265 = vmatprep.subr.mxu1 %v326_v0 }
  0x2a   :  { %266 = vmatpush3.msra.mxu1 %v134_v10 }
  0x2b   :  { %267 = vmatprep.subr.mxu1 %v326_v0 }
  0x2c   :  { %268 = vmatpush3.msra.mxu1 %v133_v11 }
  0xe1   :  { %v128_v13 = vpop.f32.mrf.mxu0 }
  0xe2   :  { %v129_v14 = vadd.f32 %v230_v12, %v128_v13 }
  0xe3   :  { %v252_v15 = vpop.f32.mrf.mxu0 }
  0xe4   :  { %v132_v16 = vmax.f32 %v129_v14, 0.0 }
  0xe6   :  { %270 = vmatmul.mubr.msk.f32.vlgmr.msra.gmra.mxu1 %vm148_vm2, %v132_v16 }
 0x1a6   :  { %v218_v18 = vpop.f32.mrf.mxu1 }
 0x1a7   :  { %v219_v19 = vadd.f32 %v232_v17, %v218_v18 }
 0x1a8   :  { %v271_v20 = vpop.f32.mrf.mxu1 }
 0x1a9   :  { %223 = vst.msk [vmem:[%s381_s5] sm:$0xff] %vm222_vm3, %v219_v19 }
 0x1aa   :  { %228 = vsyncpa [#allocation3], 1 }
 0x1ab   :  { %229 = vsyncpa [#allocation5], 1 }

</bundles_post_ra>
